<compile_context>
chip_gen: v6e
topology: v6e:2x2x1
jax: 0.10.0
libtpu: 0.0.40
codegen_flags: <defaults>
</compile_context>

<pallas_src>
import functools

import jax
import jax.numpy as jnp
from jax.experimental import pallas as pl
from jax.experimental.pallas import tpu as pltpu

LANE = 128


def _round_up(n, m):
    return (n + m - 1) // m * m


# ----------------------------------------------------------------------------
# Kernel
# ----------------------------------------------------------------------------
def _splitnn_kernel(x_ref, w1_ref, b1_ref, w2_ref, b2_ref, out_ref,
                    *, n_valid_out, apply_softmax):
    # Fused (ind + shared) first layer: Linear + ReLU.
    # x is cast to bf16 in-kernel so the original dtype streams from HBM.
    x = x_ref[...].astype(jnp.bfloat16)
    h = jnp.dot(x, w1_ref[...], preferred_element_type=jnp.float32) + b1_ref[...]
    h = jnp.maximum(h, 0.0)

    # Aggregation layer on concat([h_ind, h_shared]); h already *is* that
    # concat (cols [:H] = ind branch, [H:2H] = shared branch, rest zero-pad),
    # so a single matmul against the zero-padded agg weight is exact.
    logits = (
        jnp.dot(h.astype(jnp.bfloat16), w2_ref[...],
                preferred_element_type=jnp.float32)
        + b2_ref[...]
    )

    if apply_softmax:
        # Fused softmax epilogue over the real n_valid_out columns only
        # (padded lanes hold exact zeros; mask them out of max/sum).
        col = jax.lax.broadcasted_iota(jnp.int32, logits.shape, 1)
        valid = col < n_valid_out
        m = jnp.max(jnp.where(valid, logits, -jnp.inf), axis=-1, keepdims=True)
        p = jnp.where(valid, jnp.exp(logits - m), 0.0)
        denom = jnp.sum(p, axis=-1, keepdims=True)
        logits = p * pl.reciprocal(denom, approx=True)

    out_ref[...] = logits.astype(out_ref.dtype)


# ----------------------------------------------------------------------------
# One-time parameter preparation (hoisted out of the per-call path)
# ----------------------------------------------------------------------------
def prepare_params(params, ind_columns, shared_columns, n_features):
    """Build the fused, lane-padded, bf16 weights once."""
    H = params["w_ind"].shape[1]
    C = params["w_agg"].shape[1]
    H2 = 2 * H
    H2_pad = _round_up(max(H2, LANE), LANE)   # lane-dense hidden block
    C_pad = _round_up(max(C, LANE), LANE)     # lane-dense output block

    ind = jnp.asarray(ind_columns, jnp.int32)
    sh = jnp.asarray(shared_columns, jnp.int32)

    # W1[ind_columns, :H] = w_ind, W1[shared_columns, H:2H] = w_sh, zeros else.
    # x @ W1 == concat([x[:, ind] @ w_ind, x[:, shared] @ w_sh], axis=1).
    # Scatter-ADD so duplicated column indices sum (same as gather-then-matmul).
    w1 = jnp.zeros((n_features, H2_pad), jnp.float32)
    w1 = w1.at[ind, 0:H].add(params["w_ind"].astype(jnp.float32))
    w1 = w1.at[sh, H:H2].add(params["w_sh"].astype(jnp.float32))

    b1 = jnp.zeros((1, H2_pad), jnp.float32)
    b1 = b1.at[:, 0:H].set(params["b_ind"].astype(jnp.float32))
    b1 = b1.at[:, H:H2].set(params["b_sh"].astype(jnp.float32))

    # Agg layer padded to (H2_pad, C_pad); padded rows/cols are zero, so the
    # extra ReLU(0) hidden lanes contribute nothing and stores stay full-lane.
    w2 = jnp.zeros((H2_pad, C_pad), jnp.float32)
    w2 = w2.at[0:H2, 0:C].set(params["w_agg"].astype(jnp.float32))
    b2 = jnp.zeros((1, C_pad), jnp.float32)
    b2 = b2.at[:, 0:C].set(params["b_agg"].astype(jnp.float32))

    return {
        "w1": w1.astype(jnp.bfloat16),   # bf16 MXU inputs, f32 accumulate
        "b1": b1,                        # biases stay f32
        "w2": w2.astype(jnp.bfloat16),
        "b2": b2,
        "n_features": n_features,
        "hidden2_pad": H2_pad,
        "n_classes": C,
        "n_classes_pad": C_pad,
    }


def _choose_batch_tiling(B, tile_b_max):
    """Pick (tile_b, n_tiles): big tiles, >=2 grid steps when B allows, and a
    tile derived from the step count so no jnp.pad copy of x is needed."""
    tile_b_max = max(8, _round_up(int(tile_b_max), 8))
    n_tiles = max(1, pl.cdiv(B, tile_b_max))
    if n_tiles == 1 and B >= 16:
        n_tiles = 2            # lets "parallel" shard across v7x's two TCs
    tile_b = _round_up(pl.cdiv(B, n_tiles), 8)
    n_tiles = pl.cdiv(B, tile_b)
    return tile_b, n_tiles


# ----------------------------------------------------------------------------
# Forward / predict
# ----------------------------------------------------------------------------
def splitnn_forward(x, prepared, *, tile_b_max=2048, apply_softmax=False):
    """x: [B, F] tabular input (any numeric dtype; cast happens in-kernel)."""
    B, F = x.shape
    assert F == prepared["n_features"], (F, prepared["n_features"])
    H2_pad = prepared["hidden2_pad"]
    C = prepared["n_classes"]
    C_pad = prepared["n_classes_pad"]

    tile_b, n_tiles = _choose_batch_tiling(B, tile_b_max)

    kernel = functools.partial(
        _splitnn_kernel, n_valid_out=C, apply_softmax=apply_softmax)

    flops = 2 * B * F * H2_pad + 2 * B * H2_pad * C_pad
    bytes_accessed = int(
        x.size * x.dtype.itemsize
        + prepared["w1"].size * 2 + prepared["b1"].size * 4
        + prepared["w2"].size * 2 + prepared["b2"].size * 4
        + B * C_pad * 2                                   # bf16 output
    )

    out = pl.pallas_call(
        kernel,
        out_shape=jax.ShapeDtypeStruct((B, C_pad), jnp.bfloat16),
        grid=(n_tiles,),
        in_specs=[
            # x streams over the batch; weights/biases are VMEM-resident
            # (constant index_map). For very wide tabular F (multi-MiB W1),
            # consider pipeline_mode=pl.Buffered(1) on the weight specs or a
            # K-over-F grid axis to stay inside v7x's 64 MiB VMEM.
            pl.BlockSpec((tile_b, F), lambda i: (i, 0)),
            pl.BlockSpec((F, H2_pad), lambda i: (0, 0)),
            pl.BlockSpec((1, H2_pad), lambda i: (0, 0)),
            pl.BlockSpec((H2_pad, C_pad), lambda i: (0, 0)),
            pl.BlockSpec((1, C_pad), lambda i: (0, 0)),
        ],
        out_specs=pl.BlockSpec((tile_b, C_pad), lambda i: (i, 0)),
        compiler_params=pltpu.CompilerParams(
            dimension_semantics=("parallel",),          # megacore on v7x
            # > v5e's 16 MiB scoped default, < v7x's 64 MiB physical VMEM.
            vmem_limit_bytes=48 * 1024 * 1024,
        ),
        cost_estimate=pl.CostEstimate(
            flops=flops,
            transcendentals=(B * C_pad if apply_softmax else 0),
            bytes_accessed=bytes_accessed),
    )(x, prepared["w1"], prepared["b1"], prepared["w2"], prepared["b2"])

    # Real C columns; cast the (tiny) result back to f32 for the caller.
    return out[:, :C].astype(jnp.float32)


def splitnn_predict(x, prepared, *, tile_b_max=2048):
    # `predict` = softmax over logits, fused into the kernel epilogue.
    return splitnn_forward(x, prepared, tile_b_max=tile_b_max,
                           apply_softmax=True)


# ----------------------------------------------------------------------------
# Reference + init helpers
# ----------------------------------------------------------------------------
def init_params(key, d_ind, d_shared, hidden, n_classes):
    ks = jax.random.split(key, 6)
    scale = 0.1
    return {
        "w_ind": scale * jax.random.normal(ks[0], (d_ind, hidden), jnp.float32),
        "b_ind": scale * jax.random.normal(ks[1], (1, hidden), jnp.float32),
        "w_sh": scale * jax.random.normal(ks[2], (d_shared, hidden), jnp.float32),
        "b_sh": scale * jax.random.normal(ks[3], (1, hidden), jnp.float32),
        "w_agg": scale * jax.random.normal(ks[4], (2 * hidden, n_classes), jnp.float32),
        "b_agg": scale * jax.random.normal(ks[5], (1, n_classes), jnp.float32),
    }


def splitnn_reference(x, params, ind_columns, shared_columns):
    """Pure-JAX f32 reference for correctness check."""
    x = x.astype(jnp.float32)
    h_ind = jnp.maximum(x[:, ind_columns] @ params["w_ind"] + params["b_ind"], 0.0)
    h_sh = jnp.maximum(x[:, shared_columns] @ params["w_sh"] + params["b_sh"], 0.0)
    h = jnp.concatenate([h_ind, h_sh], axis=1)
    return h @ params["w_agg"] + params["b_agg"]


if __name__ == "__main__":
    key = jax.random.PRNGKey(0)
    k_x, k_p = jax.random.split(key)

    # Small tabular problem: 16 total columns, 10 unique to client1, 6 shared.
    B, F_TOTAL = 8, 16
    ind_columns = tuple(range(0, 10))        # columns only in client1
    shared_columns = tuple(range(10, 16))    # columns common to both clients
    HIDDEN, N_CLASSES = 32, 2

    x = jax.random.normal(k_x, (B, F_TOTAL), jnp.float32)
    params = init_params(k_p, len(ind_columns), len(shared_columns),
                         HIDDEN, N_CLASSES)

    # One-time fused-weight preparation (hoisted out of the per-call path).
    prepared = prepare_params(params, ind_columns, shared_columns, F_TOTAL)

    # Forward (logits).
    out = jax.block_until_ready(splitnn_forward(x, prepared))
    ref = splitnn_reference(x, params, ind_columns, shared_columns)
    assert out.shape == (B, N_CLASSES)
    # bf16 MXU inputs / bf16 output -> bf16-level rounding vs the f32 reference.
    assert jnp.allclose(out, ref, atol=3e-2, rtol=3e-2), (
        float(jnp.max(jnp.abs(out - ref))))

    # Predict (fused softmax epilogue).
    probs = jax.block_until_ready(splitnn_predict(x, prepared))
    ref_probs = jax.nn.softmax(ref, axis=-1)
    assert probs.shape == (B, N_CLASSES)
    assert jnp.allclose(probs, ref_probs, atol=3e-2, rtol=3e-2), (
        float(jnp.max(jnp.abs(probs - ref_probs))))

    print("KERNEL_OK")
</pallas_src>

<mosaic_0001>
module attributes {stable_mosaic.version = 11 : i64} {
  func.func @_splitnn_kernel(%arg0: i32, %arg1: memref<8x16xf32, #tpu.memory_space<vmem>>, %arg2: memref<16x128xbf16, #tpu.memory_space<vmem>>, %arg3: memref<1x128xf32, #tpu.memory_space<vmem>>, %arg4: memref<128x128xbf16, #tpu.memory_space<vmem>>, %arg5: memref<1x128xf32, #tpu.memory_space<vmem>>, %arg6: memref<8x128xbf16, #tpu.memory_space<vmem>>) attributes {dimension_semantics = [#tpu.dimension_semantics<parallel>], iteration_bounds = array<i64: 1>, scalar_prefetch = 0 : i64, scratch_operands = 0 : i64, tpu.core_type = #tpu.core_type<tc>, window_params = [{transform_indices = @transform_0, window_bounds = array<i64: 8, 16>}, {pipeline_mode = #tpu.pipeline_mode<synchronous>, transform_indices = @transform_1, window_bounds = array<i64: 16, 128>}, {pipeline_mode = #tpu.pipeline_mode<synchronous>, transform_indices = @transform_2, window_bounds = array<i64: 1, 128>}, {pipeline_mode = #tpu.pipeline_mode<synchronous>, transform_indices = @transform_3, window_bounds = array<i64: 128, 128>}, {pipeline_mode = #tpu.pipeline_mode<synchronous>, transform_indices = @transform_4, window_bounds = array<i64: 1, 128>}, {transform_indices = @transform_5, window_bounds = array<i64: 8, 128>}]} {
    %c0 = arith.constant 0 : index
    %c0_0 = arith.constant 0 : index
    %0 = vector.load %arg1[%c0, %c0_0] : memref<8x16xf32, #tpu.memory_space<vmem>>, vector<8x16xf32>
    %1 = arith.truncf %0 : vector<8x16xf32> to vector<8x16xbf16>
    %c0_1 = arith.constant 0 : index
    %c0_2 = arith.constant 0 : index
    %2 = vector.load %arg2[%c0_1, %c0_2] : memref<16x128xbf16, #tpu.memory_space<vmem>>, vector<16x128xbf16>
    %cst = arith.constant dense<0.000000e+00> : vector<8x128xf32>
    %3 = tpu.matmul %1, %2, %cst {dimension_numbers = #tpu.dot_dimension_numbers<[1], [0], [0], [1], [0, 0, 1, 1], [], []>} : vector<8x16xbf16>, vector<16x128xbf16>, vector<8x128xf32> -> vector<8x128xf32>
    %c0_3 = arith.constant 0 : index
    %c0_4 = arith.constant 0 : index
    %4 = vector.load %arg3[%c0_3, %c0_4] : memref<1x128xf32, #tpu.memory_space<vmem>>, vector<1x128xf32>
    %5 = vector.broadcast %4 : vector<1x128xf32> to vector<8x128xf32>
    %6 = arith.addf %3, %5 : vector<8x128xf32>
    %cst_5 = arith.constant 0.000000e+00 : f32
    %7 = vector.broadcast %cst_5 : f32 to vector<8x128xf32>
    %8 = arith.maximumf %6, %7 : vector<8x128xf32>
    %9 = arith.truncf %8 : vector<8x128xf32> to vector<8x128xbf16>
    %c0_6 = arith.constant 0 : index
    %c0_7 = arith.constant 0 : index
    %10 = vector.load %arg4[%c0_6, %c0_7] : memref<128x128xbf16, #tpu.memory_space<vmem>>, vector<128x128xbf16>
    %cst_8 = arith.constant dense<0.000000e+00> : vector<8x128xf32>
    %11 = tpu.matmul %9, %10, %cst_8 {dimension_numbers = #tpu.dot_dimension_numbers<[1], [0], [0], [1], [0, 0, 1, 1], [], []>} : vector<8x128xbf16>, vector<128x128xbf16>, vector<8x128xf32> -> vector<8x128xf32>
    %c0_9 = arith.constant 0 : index
    %c0_10 = arith.constant 0 : index
    %12 = vector.load %arg5[%c0_9, %c0_10] : memref<1x128xf32, #tpu.memory_space<vmem>>, vector<1x128xf32>
    %13 = vector.broadcast %12 : vector<1x128xf32> to vector<8x128xf32>
    %14 = arith.addf %11, %13 : vector<8x128xf32>
    %15 = arith.truncf %14 : vector<8x128xf32> to vector<8x128xbf16>
    %c0_11 = arith.constant 0 : index
    %c0_12 = arith.constant 0 : index
    %16 = vector.load %arg6[%c0_11, %c0_12] : memref<8x128xbf16, #tpu.memory_space<vmem>>, vector<8x128xbf16>
    tpu.vector_store %arg6[%c0_11, %c0_12], %15 {strides = array<i32>} : memref<8x128xbf16, #tpu.memory_space<vmem>>, vector<8x128xbf16>,
    return
  }
  func.func @transform_0(%arg0: i32) -> (i32, i32) {
    %c0_i32 = arith.constant 0 : i32
    %c0_i32_0 = arith.constant 0 : i32
    return %arg0, %c0_i32 : i32, i32
  }
  func.func @transform_1(%arg0: i32) -> (i32, i32) {
    %c0_i32 = arith.constant 0 : i32
    %c0_i32_0 = arith.constant 0 : i32
    %c0_i32_1 = arith.constant 0 : i32
    return %c0_i32, %c0_i32_0 : i32, i32
  }
  func.func @transform_2(%arg0: i32) -> (i32, i32) {
    %c0_i32 = arith.constant 0 : i32
    %c0_i32_0 = arith.constant 0 : i32
    %c0_i32_1 = arith.constant 0 : i32
    return %c0_i32, %c0_i32_0 : i32, i32
  }
  func.func @transform_3(%arg0: i32) -> (i32, i32) {
    %c0_i32 = arith.constant 0 : i32
    %c0_i32_0 = arith.constant 0 : i32
    %c0_i32_1 = arith.constant 0 : i32
    return %c0_i32, %c0_i32_0 : i32, i32
  }
  func.func @transform_4(%arg0: i32) -> (i32, i32) {
    %c0_i32 = arith.constant 0 : i32
    %c0_i32_0 = arith.constant 0 : i32
    %c0_i32_1 = arith.constant 0 : i32
    return %c0_i32, %c0_i32_0 : i32, i32
  }
  func.func @transform_5(%arg0: i32) -> (i32, i32) {
    %c0_i32 = arith.constant 0 : i32
    %c0_i32_0 = arith.constant 0 : i32
    return %arg0, %c0_i32 : i32, i32
  }
}

</mosaic_0001>

<bundles_post_ra>
// kernel: tpu_custom_call.1
= control target key start
LH: loop header
LB: loop body
LE: loop exit
PB: predicated region body
PF: predicated region fallthrough
CT: control target
= control target key end

     0   :  { %10 = vsyncpa [#allocation3], 0  ;;  %s461_s0 = inlined_call_operand.hbm [shape: f32[8,16], index: 0, kind: input, shape index: {}]   ;;  %s462_s1 = inlined_call_operand.hbm [shape: bf16[16,128], index: 1, kind: input, shape index: {}]   ;;  %s463_s2 = inlined_call_operand.vmem [shape: f32[1,128], index: 2, kind: input, shape index: {}]   ;;  %s464_s3 = inlined_call_operand.hbm [shape: bf16[128,128], index: 3, kind: input, shape index: {}]   ;;  %s465_s4 = inlined_call_operand.vmem [shape: f32[1,128], index: 4, kind: input, shape index: {}]   ;;  %s466_s5 = inlined_call_operand.hbm [shape: bf16[8,128], index: 5, kind: output, shape index: {}]  }
   0x1   :  { %11 = vsyncpa [#allocation6], 0 }
   0x2   :  { %12 = vsyncpa [#allocation4], 0  ;;  %s405_s18 = smov [#allocation5]  }
   0x3   :  { %s28_s19 = sshll.u32 %s405_s18, 4  ;;  %s29_s19 = int_to_ptr.vmem [resolvable:$true] %s28_s19 }
   0x4   :  { %s327_s20 = scalar_lea.vmem %s29_s19, 128  ;;  %p332_p1 = scmp.lt.s32.totalorder %s29_s19, %s29_s19 }
   0x5   :  { %p328_p0 = scmp.ne.s32.totalorder %s29_s19, %s327_s20  ;;  %p333_p2 = scmp.lt.s32.totalorder %s327_s20, %s327_s20 }
   0x7   :  { %p334_p3 = por %p333_p2, %p332_p1 }
   0x9   :  { %p335_p4 = pnand %p334_p3, %p328_p0 }
   0xb   :  { %338 = shalt.err (!%p335_p4)
}
   0xc   :  { %s406_s21 = smov 64   ;;  %s407_s22 = smov 4  }
   0xd   :  { %34 = dma.hbm_to_vmem [thread:$0]  %s462_s1, 128, %s29_s19, [#allocation6], %s406_s21, %s406_s21, %s407_s22  }
   0xe   :  { %s408_s25 = smov [#allocation2]   ;;  %s409_s27 = smov [#allocation7]  }
   0xf   :  { %s19_s26 = sshll.u32 %s408_s25, 4  ;;  %s42_s28 = sshll.u32 %s409_s27, 4  ;;  %s20_s26 = int_to_ptr.vmem [resolvable:$true] %s19_s26  ;;  %s43_s28 = int_to_ptr.vmem [resolvable:$true] %s42_s28 }
  0x10   :  { %s347_s29 = scalar_lea.vmem %s20_s26, 128  ;;  %p352_p6 = scmp.lt.s32.totalorder %s20_s26, %s20_s26 }
  0x11   :  { %p348_p5 = scmp.ne.s32.totalorder %s20_s26, %s347_s29  ;;  %p353_p7 = scmp.lt.s32.totalorder %s347_s29, %s347_s29 }
  0x13   :  { %p354_p8 = por %p353_p7, %p352_p6 }
  0x15   :  { %p355_p9 = pnand %p354_p8, %p348_p5 }
  0x17   :  { %358 = shalt.err (!%p355_p9)
}
  0x18   :  { %22 = dma.hbm_to_vmem [thread:$0]  %s461_s0, 128, %s20_s26, [#allocation3]  }
  0x19   :  { %s367_s7 = scalar_lea.vmem %s43_s28, 1024  ;;  %p372_p11 = scmp.lt.s32.totalorder %s43_s28, %s43_s28 }
  0x1a   :  { %p368_p10 = scmp.ne.s32.totalorder %s43_s28, %s367_s7  ;;  %p373_p12 = scmp.lt.s32.totalorder %s367_s7, %s367_s7 }
  0x1c   :  { %p374_p13 = por %p373_p12, %p372_p11 }
  0x1e   :  { %p375_p0 = pnand %p374_p13, %p368_p10 }
  0x20   :  { %378 = shalt.err (!%p375_p0)
}
  0x21   :  { %48 = dma.hbm_to_vmem [thread:$0]  %s464_s3, 1024, %s43_s28, [#allocation6], %s406_s21, %s406_s21, %s407_s22  }
  0x22   :  { %399 = dma.done.wait [#allocation3], 128  }
  0x23   :  { %400 = vsyncadd [#allocation3], 4294967168 }
  0x24   :  { %401 = dma.done.wait [#allocation6], 1152  }
  0x25   :  { %402 = vsyncadd [#allocation6], 4294966144  ;;  %v410_v0 = vmov 0.0   ;;  %vm411_vm0 = vmmov 0   ;;  %v310_v1 = vld [vmem:[#allocation5] sm:$0xff]   ;;  %v61_v2 = vld [vmem:[#allocation2] sm:$0xff] }
  0x26   :  { %276 = vmatprep.subr.bf16.mxu0 %v410_v0  ;;  %278 = vmatprep.mubr.msk.bf16.mxu0 %vm411_vm0, %v410_v0  ;;  %v62_v3 = vpack.c.bf16 %v61_v2, %v61_v2  ;;  %vm78_vm1 = vcmask 130048   ;;  %v311_v4 = vld [vmem:[#allocation7 + $0x38] sm:$0xff]   ;;  %v312_v5 = vld [vmem:[#allocation7 + $0x30] sm:$0xff]   ;;  %v313_v6 = vld [vmem:[#allocation7 + $0x28] sm:$0xff]   ;;  %s412_s11 = smov [#allocation8]  }
  0x27   :  { %282 = vmatprep.subr.bf16.mxu1 %v410_v0  ;;  %298 = vmatprep.mubr.msk.bf16.mxu1 %vm411_vm0, %v410_v0  ;;  %v314_v7 = vld [vmem:[#allocation7 + $0x20] sm:$0xff]   ;;  %v315_v8 = vld [vmem:[#allocation7 + $0x18] sm:$0xff]   ;;  %v316_v9 = vld [vmem:[#allocation7 + $0x10] sm:$0xff]   ;;  %s243_s12 = sshll.u32 %s412_s11, 4  ;;  %s244_s12 = int_to_ptr.vmem [resolvable:$true] %s243_s12 }
  0x28   :  { %277 = vmatpush3.bf16.msra.mxu0 %v310_v1  ;;  %283 = vmatpush3.bf16.msra.mxu1 %v311_v4  ;;  %v317_v10 = vld [vmem:[#allocation7 + $0x8] sm:$0xff]   ;;  %v318_v11 = vld [vmem:[#allocation7] sm:$0xff]   ;;  %v253_v12 = vld [vmem:[%s463_s2] ss:$0 sm:$0xff]  ;;  %s379_s2 = scalar_lea.vmem %s244_s12, 64  ;;  %p384_p2 = scmp.lt.s32.totalorder %s244_s12, %s244_s12 }
  0x29   :  { %284 = vmatprep.subr.bf16.mxu1 %v410_v0  ;;  %v256_v20 = vld [vmem:[%s465_s4] ss:$0 sm:$0xff]  ;;  %p380_p1 = scmp.ne.s32.totalorder %s244_s12, %s379_s2  ;;  %p385_p3 = scmp.lt.s32.totalorder %s379_s2, %s379_s2 }
  0x2b   :  { %279 = vmatmul.mubr.msk.bf16.vlgmr.msra.gmra.mxu0 %vm78_vm1, %v62_v3  ;;  %p386_p4 = por %p385_p3, %p384_p2 }
  0x2c   :  { %285 = vmatpush3.bf16.msra.mxu1 %v312_v5 }
  0x2d   :  { %286 = vmatprep.subr.bf16.mxu1 %v410_v0  ;;  %p387_p5 = pnand %p386_p4, %p380_p1 }
  0x30   :  { %287 = vmatpush3.bf16.msra.mxu1 %v313_v6 }
  0x31   :  { %288 = vmatprep.subr.bf16.mxu1 %v410_v0 }
  0x34   :  { %289 = vmatpush3.bf16.msra.mxu1 %v314_v7 }
  0x35   :  { %290 = vmatprep.subr.bf16.mxu1 %v410_v0 }
  0x38   :  { %291 = vmatpush3.bf16.msra.mxu1 %v315_v8 }
  0x39   :  { %292 = vmatprep.subr.bf16.mxu1 %v410_v0 }
  0x3c   :  { %293 = vmatpush3.bf16.msra.mxu1 %v316_v9 }
  0x3d   :  { %294 = vmatprep.subr.bf16.mxu1 %v410_v0 }
  0x40   :  { %295 = vmatpush3.bf16.msra.mxu1 %v317_v10 }
  0x41   :  { %296 = vmatprep.subr.bf16.mxu1 %v410_v0 }
  0x44   :  { %297 = vmatpush3.bf16.msra.mxu1 %v318_v11 }
  0xeb   :  { %v116_v13 = vpop.f32.mrf.mxu0 }
  0xec   :  { %v117_v14 = vadd.f32 %v253_v12, %v116_v13 }
  0xed   :  { %v280_v15 = vpop.f32.mrf.mxu0 }
  0xee   :  { %v122_v16 = vmax.f32 %v117_v14, 0.0 }
  0xef   :  { %v119_v17 = vpop.f32.mrf.mxu0 }
  0xf0   :  { %v123_v18 = vpack.c.bf16 %v122_v16, %v122_v16 }
  0xf1   :  { %v281_v19 = vpop.f32.mrf.mxu0 }
  0xf2   :  { %299 = vmatmul.mubr.bf16.vlgmr.msra.gmra.mxu1 %v123_v18 }
 0x1b2   :  { %v229_v21 = vpop.f32.mrf.mxu1 }
 0x1b3   :  { %v230_v22 = vadd.f32 %v256_v20, %v229_v21 }
 0x1b4   :  { %v300_v23 = vpop.f32.mrf.mxu1 }
 0x1b5   :  { %v235_v24 = vpack.c.bf16 %v230_v22, %v230_v22 }
 0x1b6   :  { %v232_v25 = vpop.f32.mrf.mxu1 }
 0x1b7   :  { %236 = vst [vmem:[#allocation8] sm:$0xf] %v235_v24 }
 0x1b8   :  { %v301_v26 = vpop.f32.mrf.mxu1 }
 0x1b9   :  { %390 = shalt.err (!%p387_p5)
}
 0x1ba   :  { %246 = dma.vmem_to_hbm [thread:$0]  %s244_s12, 64, %s466_s5, [#allocation4]  }
 0x1bb   :  { %403 = dma.done.wait [#allocation4], 64  }
 0x1bc   :  { %404 = vsyncadd [#allocation4], 4294967232 }
 0x1bd   :  { %250 = vsyncpa [#allocation3], 1 }
 0x1be   :  { %251 = vsyncpa [#allocation6], 1 }
 0x1bf   :  { %252 = vsyncpa [#allocation4], 1 }

</bundles_post_ra>
